<compile_context>
chip_gen: v7x
topology: tpu7x:2x2x1
jax: 0.10.0
libtpu: 0.0.40
codegen_flags: <defaults>
</compile_context>

<pallas_src>
import jax
import jax.numpy as jnp
from jax.experimental import pallas as pl
from jax.experimental.pallas import tpu as pltpu

_LANE = 128
_MIN_BLK_LP = 128        # below this many log_prob rows, don't split the grid
_TARGET_BLK_LP = 2048    # 2048 lp-rows -> ~3 MiB (x + lp) per grid step
_MIN_PALLAS_ELEMS = 1 << 16   # below this total output size, launch overhead dominates


def _round_up(a: int, b: int) -> int:
    return (a + b - 1) // b * b


def _fill_kernel(p_ref, x_ref, lp_ref):
    # p_ref: SMEM (1, 1) scalar parameter
    # x_ref: VMEM (2*blk, 128) slice of the flattened x slab
    # lp_ref: VMEM (blk, 128) slice of the flattened log_prob slab
    p = p_ref[0, 0]
    x_val = 2.0 * p
    lp_val = 0.0 * p      # mirrors torch.zeros(n) * p -> NaN/inf in p must propagate
    x_ref[...] = jnp.broadcast_to(x_val, x_ref.shape)
    lp_ref[...] = jnp.broadcast_to(lp_val, lp_ref.shape)


def _choose_grid(rows_lp: int):
    """Pick (blk_lp, num_blocks): big blocks, even count for v7x TC balance."""
    if rows_lp <= 2 * _MIN_BLK_LP:
        return rows_lp, 1                       # single full-extent block (always legal)
    num_blocks = min(pl.cdiv(rows_lp, _MIN_BLK_LP),
                     max(8, pl.cdiv(rows_lp, _TARGET_BLK_LP)))
    num_blocks = max(2, num_blocks - (num_blocks % 2))   # even -> balanced megacore split
    blk_lp = _round_up(pl.cdiv(rows_lp, num_blocks), 8)  # keep (8,128) tiling legal
    return blk_lp, pl.cdiv(rows_lp, blk_lp)


def _xla_fill(n, p):
    # Minimum-byte direct fill into the final layouts.
    x = 2.0 * p * jnp.ones((n, 2), dtype=jnp.float32)
    lp = jnp.zeros((n,), dtype=jnp.float32) * p
    return x, lp


def mock_posterior_estimator_forward(n, p, *, min_pallas_elems=_MIN_PALLAS_ELEMS):
    """Returns (x, log_prob) matching MockPosteriorEstimator.forward(n)."""
    n = int(n)
    p = jnp.asarray(p, dtype=jnp.float32).reshape(())   # errors loudly on non-scalar p
    if n == 0:
        return jnp.zeros((0, 2), jnp.float32), jnp.zeros((0,), jnp.float32)

    # Pallas path only when the final reshapes are exact (no slice-copies) and the
    # output is large enough to amortize the launch; otherwise XLA fill wins.
    if (n % _LANE != 0) or (3 * n < min_pallas_elems):
        return _xla_fill(n, p)

    rows_lp = n // _LANE            # log_prob rows;  x rows = 2 * rows_lp exactly
    blk_lp, num_blocks = _choose_grid(rows_lp)

    x_slab, lp_slab = pl.pallas_call(
        _fill_kernel,
        out_shape=(jax.ShapeDtypeStruct((2 * rows_lp, _LANE), jnp.float32),
                   jax.ShapeDtypeStruct((rows_lp, _LANE), jnp.float32)),
        grid=(num_blocks,),
        in_specs=[pl.BlockSpec(memory_space=pltpu.SMEM)],
        out_specs=(pl.BlockSpec((2 * blk_lp, _LANE), lambda i: (i, 0)),
                   pl.BlockSpec((blk_lp, _LANE), lambda i: (i, 0))),
        compiler_params=pltpu.CompilerParams(
            dimension_semantics=("parallel",)),   # v7x: 2 TCs split the store work
    )(p.reshape(1, 1))

    # Exact-size, contiguous row-major reshapes -> no slice copies in the wrapper.
    return x_slab.reshape(n, 2), lp_slab.reshape(n)


if __name__ == "__main__":
    _ = jax.random.PRNGKey(0)   # forward(n) takes no tensor input; kept for determinism
    p = jnp.float32(1.0)        # module initializes self.p = 1.0

    cases = [
        (8,     dict()),                       # tiny n -> XLA fill fallback
        (1024,  dict(min_pallas_elems=0)),     # small n forced through Pallas (1 block)
        (65536, dict()),                       # larger n -> multi-block parallel grid
    ]
    results = [(n, mock_posterior_estimator_forward(n, p, **kw)) for n, kw in cases]
    jax.block_until_ready([r for _, r in results])

    for n, (x, lp) in results:
        assert x.shape == (n, 2) and x.dtype == jnp.float32
        assert lp.shape == (n,) and lp.dtype == jnp.float32
        assert jnp.allclose(x, 2.0 * jnp.ones((n, 2), jnp.float32))
        assert jnp.allclose(lp, jnp.zeros((n,), jnp.float32))

    # torch semantics: zeros(n) * p -> NaN in p must propagate into log_prob.
    x_nan, lp_nan = mock_posterior_estimator_forward(
        1024, jnp.float32(jnp.nan), min_pallas_elems=0)
    jax.block_until_ready((x_nan, lp_nan))
    assert bool(jnp.all(jnp.isnan(x_nan))) and bool(jnp.all(jnp.isnan(lp_nan)))

    # n == 0 guard (review correctness concern).
    x0, lp0 = mock_posterior_estimator_forward(0, p)
    assert x0.shape == (0, 2) and lp0.shape == (0,)

    # TODO(synk): autograd w.r.t. p (requires_grad=True in torch) is out of scope
    # for a forward-only fill kernel.
    print("KERNEL_OK")
</pallas_src>

<mosaic_0001>
module attributes {stable_mosaic.version = 11 : i64} {
  func.func @_fill_kernel(%arg0: i32, %arg1: memref<1x1xf32, #tpu.memory_space<smem>>, %arg2: memref<16x128xf32, #tpu.memory_space<vmem>>, %arg3: memref<8x128xf32, #tpu.memory_space<vmem>>) attributes {dimension_semantics = [#tpu.dimension_semantics<parallel>], iteration_bounds = array<i64: 1>, scalar_prefetch = 0 : i64, scratch_operands = 0 : i64, tpu.core_type = #tpu.core_type<tc>, window_params = [{transform_indices = @transform_0, window_bounds = array<i64: 1, 1>}, {transform_indices = @transform_1, window_bounds = array<i64: 16, 128>}, {transform_indices = @transform_2, window_bounds = array<i64: 8, 128>}]} {
    %c0 = arith.constant 0 : index
    %c0_0 = arith.constant 0 : index
    %0 = memref.load %arg1[%c0, %c0_0] : memref<1x1xf32, #tpu.memory_space<smem>>
    %cst = arith.constant 2.000000e+00 : f32
    %1 = arith.mulf %cst, %0 : f32
    %cst_1 = arith.constant 0.000000e+00 : f32
    %2 = arith.mulf %cst_1, %0 : f32
    %3 = vector.broadcast %1 : f32 to vector<16x128xf32>
    %c0_2 = arith.constant 0 : index
    %c0_3 = arith.constant 0 : index
    %4 = vector.load %arg2[%c0_2, %c0_3] : memref<16x128xf32, #tpu.memory_space<vmem>>, vector<16x128xf32>
    tpu.vector_store %arg2[%c0_2, %c0_3], %3 {strides = array<i32>} : memref<16x128xf32, #tpu.memory_space<vmem>>, vector<16x128xf32>,
    %5 = vector.broadcast %2 : f32 to vector<8x128xf32>
    %c0_4 = arith.constant 0 : index
    %c0_5 = arith.constant 0 : index
    %6 = vector.load %arg3[%c0_4, %c0_5] : memref<8x128xf32, #tpu.memory_space<vmem>>, vector<8x128xf32>
    tpu.vector_store %arg3[%c0_4, %c0_5], %5 {strides = array<i32>} : memref<8x128xf32, #tpu.memory_space<vmem>>, vector<8x128xf32>,
    return
  }
  func.func @transform_0(%arg0: i32) -> (i32, i32) {
    %c0_i32 = arith.constant 0 : i32
    %c0_i32_0 = arith.constant 0 : i32
    %c0_i32_1 = arith.constant 0 : i32
    return %c0_i32, %c0_i32_0 : i32, i32
  }
  func.func @transform_1(%arg0: i32) -> (i32, i32) {
    %c0_i32 = arith.constant 0 : i32
    %c0_i32_0 = arith.constant 0 : i32
    return %arg0, %c0_i32 : i32, i32
  }
  func.func @transform_2(%arg0: i32) -> (i32, i32) {
    %c0_i32 = arith.constant 0 : i32
    %c0_i32_0 = arith.constant 0 : i32
    return %arg0, %c0_i32 : i32, i32
  }
}

</mosaic_0001>

<bundles_post_ra>
// kernel: tpu_custom_call.1
= control target key start
LH: loop header
LB: loop body
LE: loop exit
PB: predicated region body
PF: predicated region fallthrough
CT: control target
= control target key end

     0   :  { %9 = vsyncpa [#allocation4], 0  ;;  %s152_s0 = inlined_call_operand.<no memory space> [shape: f32[1,1], index: 0, kind: input, shape index: {}]   ;;  %s153_s1 = inlined_call_operand.hbm [shape: f32[16,128], index: 1, kind: output, shape index: {0}]   ;;  %s154_s2 = inlined_call_operand.hbm [shape: f32[8,128], index: 2, kind: output, shape index: {1}]  }
   0x1   :  { %s14_s11 = smul.f32 2.0, %s152_s0 }
   0x2   :  { %10 = vsyncpa [#allocation6], 0  ;;  %s15_s14 = smul.f32 0.0, %s152_s0  ;;  %s103_s15 = smov [#allocation3]  }
   0x3   :  { %s26_s16 = sshll.u32 %s103_s15, 4  ;;  %v16_v0 = vstv %s14_s11  ;;  %s27_s16 = int_to_ptr.vmem [resolvable:$true] %s26_s16 }
   0x4   :  { %17 = vst [vmem:[#allocation3] sm:$0xff] %v16_v0  ;;  %18 = vst [vmem:[#allocation3 + $0x8] sm:$0xff] %v16_v0  ;;  %v19_v1 = vstv %s15_s14  ;;  %s55_s17 = scalar_lea.vmem %s27_s16, 256  ;;  %p60_p1 = scmp.lt.s32.totalorder %s27_s16, %s27_s16 }
   0x5   :  { %20 = vst [vmem:[#allocation5] sm:$0xff] %v19_v1  ;;  %p56_p0 = scmp.ne.s32.totalorder %s27_s16, %s55_s17  ;;  %p61_p2 = scmp.lt.s32.totalorder %s55_s17, %s55_s17 }
   0x7   :  { %p62_p3 = por %p61_p2, %p60_p1 }
   0x9   :  { %p63_p4 = pnand %p62_p3, %p56_p0 }
   0xb   :  { %66 = shalt.err (!%p63_p4)
}
   0xc   :  { %s67_s20 = scalar_lea.hbm %s153_s1, 256 }
   0xd   :  { %p68_p5 = scmp.ne.s32.totalorder %s153_s1, %s67_s20  ;;  %p71_p6 = scmp.lt.u32.totalorder %s67_s20, %s153_s1 }
   0xf   :  { %p73_p7 = pnand %p71_p6, %p68_p5 }
  0x11   :  { %76 = shalt.err (!%p73_p7)
}
  0x12   :  { %s104_s24 = smov 128   ;;  %s105_s25 = smov 8  }
  0x13   :  { %32 = dma.vmem_to_hbm [thread:$0]  %s27_s16, 256, %s153_s1, [#allocation4], %s104_s24, %s104_s24, %s105_s25  }
  0x14   :  { %s106_s28 = smov [#allocation5]  }
  0x15   :  { %s39_s29 = sshll.u32 %s106_s28, 4  ;;  %s40_s29 = int_to_ptr.vmem [resolvable:$true] %s39_s29 }
  0x16   :  { %s77_s30 = scalar_lea.vmem %s40_s29, 128  ;;  %p82_p9 = scmp.lt.s32.totalorder %s40_s29, %s40_s29 }
  0x17   :  { %p78_p8 = scmp.ne.s32.totalorder %s40_s29, %s77_s30  ;;  %p83_p10 = scmp.lt.s32.totalorder %s77_s30, %s77_s30 }
  0x19   :  { %p84_p11 = por %p83_p10, %p82_p9 }
  0x1b   :  { %p85_p12 = pnand %p84_p11, %p78_p8 }
  0x1d   :  { %88 = shalt.err (!%p85_p12)
}
  0x1e   :  { %s89_s5 = scalar_lea.hbm %s154_s2, 128 }
  0x1f   :  { %p90_p13 = scmp.ne.s32.totalorder %s154_s2, %s89_s5  ;;  %p93_p0 = scmp.lt.u32.totalorder %s89_s5, %s154_s2 }
  0x21   :  { %p95_p1 = pnand %p93_p0, %p90_p13 }
  0x23   :  { %98 = shalt.err (!%p95_p1)
}
  0x24   :  { %42 = dma.vmem_to_hbm [thread:$0]  %s40_s29, 128, %s154_s2, [#allocation6]  }
  0x25   :  { %99 = dma.done.wait [#allocation4], 256  }
  0x26   :  { %100 = vsyncadd [#allocation4], 4294967040 }
  0x27   :  { %101 = dma.done.wait [#allocation6], 128  }
  0x28   :  { %102 = vsyncadd [#allocation6], 4294967168 }
  0x29   :  { %49 = vsyncpa [#allocation4], 1 }
  0x2a   :  { %50 = vsyncpa [#allocation6], 1 }

</bundles_post_ra>
